<compile_context>
chip_gen: v7x
topology: tpu7x:2x2x1
jax: 0.10.0
libtpu: 0.0.40
codegen_flags: <defaults>
</compile_context>

<pallas_src>
import functools

import jax
import jax.numpy as jnp
from jax.experimental import pallas as pl
from jax.experimental.pallas import tpu as pltpu


def _round_up(x: int, m: int) -> int:
    return ((x + m - 1) // m) * m


def _noisy_and_kernel(p_ref, x_ref, o_ref, acc_ref, *, scale, rows, r_blk, group, w):
    """One (r_blk, lanes) tile of the streamed row reduction.

    p_ref  : SMEM f32[3] = [a*b, sigmoid(-a*b), 1/(sigmoid(a*(1-b)) - sigmoid(-a*b))]
    x_ref  : VMEM (r_blk, lanes) tile of x3 (rows = reduction, lanes = group*W)
    o_ref  : VMEM (1, w) output tile (resident across the reduction axis)
    acc_ref: VMEM (1, lanes) f32 running sum
    scale  : compile-time float = a / (C*H)
    rows   : true (unpadded) reduction extent of x3
    group  : how many reduction sub-rows were folded onto the lane axis
    w      : output lane width of this block
    """
    k = pl.program_id(2)  # reduction axis (last grid axis, "arbitrary")

    @pl.when(k == 0)
    def _init():
        acc_ref[...] = jnp.zeros_like(acc_ref)

    xt = x_ref[...]
    if rows % r_blk != 0:
        # Tail reduction block: mask out-of-bounds (stale) rows before summing.
        row = jax.lax.broadcasted_iota(jnp.int32, xt.shape, 0) + k * r_blk
        xt = jnp.where(row < rows, xt, jnp.zeros_like(xt))
    acc_ref[...] += jnp.sum(xt, axis=0, keepdims=True, dtype=jnp.float32)

    @pl.when(k == pl.num_programs(2) - 1)
    def _finalize():
        acc = acc_ref[...]                      # (1, group * w)
        tot = acc[:, :w]
        for i in range(1, group):               # fold lane groups back to W lanes
            tot = tot + acc[:, i * w:(i + 1) * w]
        a_b = p_ref[0]
        low = p_ref[1]
        inv_den = p_ref[2]
        # a * (mean - b) == sum * (a / (C*H)) - a*b ; divide replaced by multiply.
        num = jax.nn.sigmoid(tot * scale - a_b) - low
        o_ref[...] = (num * inv_den).astype(o_ref.dtype)


def noisy_and(x, b, a=10.0):
    """x: (N, C, H, W); b: scalar parameter; returns (N, 1, 1, W)."""
    N, C, H, W = x.shape
    R = C * H                       # full reduction extent
    a = float(a)                    # compile-time hyperparameter

    itemsize = x.dtype.itemsize
    sub_align = {4: 8, 2: 16, 1: 32}.get(itemsize, 8)

    # ---- lane packing: fold `g` reduction rows onto lanes when W is narrow ----
    g = 1
    if W < 128:
        max_g = max(1, min(32, 512 // max(1, W)))
        for cand in range(max_g, 1, -1):
            if R % cand == 0:
                g = cand
                break
    rows = R // g                   # reduction extent seen by the kernel
    lx = g * W                      # x lane extent seen by the kernel

    # Free, contiguous reshape — no extra HBM pass (unlike the old transpose).
    x3 = x.reshape(N, rows, lx)

    # ---- lane-block selection ----
    if g > 1 or W <= 256:
        lx_blk = lx                 # full lane extent (always layout-legal)
        w_blk = W
    else:
        lx_blk = min(1024, (W // 128) * 128)   # multiple of 128; tail handled by cdiv
        w_blk = lx_blk
    grid_j = pl.cdiv(lx, lx_blk)

    # ---- per-generation tile sizing (padded VMEM footprint) ----
    try:
        vmem_cap = int(pltpu.get_tpu_info().vmem_capacity_bytes)
    except Exception:
        vmem_cap = 64 * 1024 * 1024             # conservative (v7x-sized) fallback
    if vmem_cap <= 96 * 1024 * 1024:            # v7x: 64 MiB VMEM
        target_tile_bytes = 8 * 1024 * 1024
    else:                                       # v5e / v6e: 128 MiB VMEM
        target_tile_bytes = 16 * 1024 * 1024

    lx_pad = _round_up(lx_blk, 128)
    row_target = max(sub_align, target_tile_bytes // max(1, lx_pad * itemsize))
    if rows <= row_target:
        r_blk = rows                # full extent: single reduction step, legal block
    else:
        r_blk = max(sub_align, (row_target // sub_align) * sub_align)
    grid_k = pl.cdiv(rows, r_blk)

    # VMEM budget from the PADDED tile footprint (double-buffered x + out + acc).
    x_tile_bytes = _round_up(r_blk, sub_align) * lx_pad * itemsize
    out_tile_bytes = sub_align * _round_up(w_blk, 128) * itemsize
    acc_bytes = 8 * lx_pad * 4
    need = 2 * x_tile_bytes + 2 * out_tile_bytes + acc_bytes + (8 << 20)
    vmem_limit = int(min(max(need, 32 << 20), max(vmem_cap - (16 << 20), 32 << 20)))

    # Precompute all b-dependent scalars once; pass via SMEM (not closure constants).
    b32 = jnp.asarray(b, jnp.float32)
    low = jax.nn.sigmoid(-a * b32)
    inv_den = 1.0 / (jax.nn.sigmoid(a * (1.0 - b32)) - low)
    params = jnp.stack([a * b32, low, inv_den]).astype(jnp.float32)

    kernel = functools.partial(
        _noisy_and_kernel,
        scale=a / float(R), rows=rows, r_blk=r_blk, group=g, w=w_blk)

    out3 = pl.pallas_call(
        kernel,
        out_shape=jax.ShapeDtypeStruct((N, 1, W), x.dtype),
        grid_spec=pltpu.PrefetchScalarGridSpec(
            num_scalar_prefetch=0,
            grid=(N, grid_j, grid_k),   # (batch ∥, lane blocks ∥, reduction blocks)
            in_specs=[
                pl.BlockSpec(memory_space=pltpu.MemorySpace.SMEM),        # folded scalars
                pl.BlockSpec((None, r_blk, lx_blk), lambda n, j, k: (n, k, j)),
            ],
            out_specs=pl.BlockSpec((None, 1, w_blk), lambda n, j, k: (n, 0, j)),
            scratch_shapes=[pltpu.VMEM((1, lx_blk), jnp.float32)],
        ),
        compiler_params=pltpu.CompilerParams(
            dimension_semantics=("parallel", "parallel", "arbitrary"),
            vmem_limit_bytes=vmem_limit,
        ),
        # NOTE: pipeline_mode=pl.Buffered(3) on the x spec may recover a few % on
        # v7x once tiles are 8 MiB — measure before enabling (likely neutral v5e/v6e).
    )(params, x3)

    return out3.reshape(N, 1, 1, W)


def noisy_and_ref(x, b, a=10.0):
    mean = jnp.mean(x, axis=(1, 2), keepdims=True)
    sig = jax.nn.sigmoid
    low = sig(-a * b)
    return (sig(a * (mean - b)) - low) / (sig(a * (1.0 - b)) - low)


if __name__ == "__main__":
    key = jax.random.PRNGKey(0)
    N, C, H, W = 2, 4, 16, 16
    x = jax.random.uniform(key, (N, C, H, W), dtype=jnp.float32)

    a = 10.0
    b = jnp.float32(0.01)  # torch.nn.Parameter(torch.tensor(0.01))

    out = noisy_and(x, b, a)
    out = jax.block_until_ready(out)

    ref = noisy_and_ref(x, b, a)
    assert out.shape == (N, 1, 1, W), out.shape
    assert jnp.allclose(out, ref, atol=1e-5, rtol=1e-5), "mismatch vs reference"

    print("KERNEL_OK")
</pallas_src>

<mosaic_0001>
module attributes {stable_mosaic.version = 11 : i64} {
  func.func @_noisy_and_kernel(%arg0: i32, %arg1: i32, %arg2: i32, %arg3: memref<3xf32, #tpu.memory_space<smem>>, %arg4: memref<1x2x512xf32, #tpu.memory_space<vmem>>, %arg5: memref<1x1x16xf32, #tpu.memory_space<vmem>>, %arg6: memref<1x512xf32, #tpu.memory_space<vmem>>) attributes {dimension_semantics = [#tpu.dimension_semantics<parallel>, #tpu.dimension_semantics<parallel>, #tpu.dimension_semantics<arbitrary>], iteration_bounds = array<i64: 2, 1, 1>, scalar_prefetch = 0 : i64, scratch_operands = 1 : i64, tpu.core_type = #tpu.core_type<tc>, window_params = [{transform_indices = @transform_0, window_bounds = array<i64: 3>}, {transform_indices = @transform_1, window_bounds = array<i64: 1, 2, 512>}, {transform_indices = @transform_2, window_bounds = array<i64: 1, 1, 16>}]} {
    %c0_i32 = arith.constant 0 : i32
    %0 = arith.cmpi eq, %arg2, %c0_i32 : i32
    %1 = arith.extui %0 : i1 to i32
    %c0_i32_0 = arith.constant 0 : i32
    %2 = arith.cmpi ne, %1, %c0_i32_0 : i32
    scf.if %2 {
      %cst_9 = arith.constant 0.000000e+00 : f32
      %13 = vector.broadcast %cst_9 : f32 to vector<1x512xf32>
      %c0_10 = arith.constant 0 : index
      %c0_11 = arith.constant 0 : index
      %14 = vector.load %arg6[%c0_10, %c0_11] : memref<1x512xf32, #tpu.memory_space<vmem>>, vector<1x512xf32>
      tpu.vector_store %arg6[%c0_10, %c0_11], %13 {strides = array<i32>} : memref<1x512xf32, #tpu.memory_space<vmem>>, vector<1x512xf32>,
    } else {
    }
    %c0 = arith.constant 0 : index
    %c0_1 = arith.constant 0 : index
    %c0_2 = arith.constant 0 : index
    %3 = vector.load %arg4[%c0, %c0_1, %c0_2] : memref<1x2x512xf32, #tpu.memory_space<vmem>>, vector<1x2x512xf32>
    %4 = vector.shape_cast %3 : vector<1x2x512xf32> to vector<2x512xf32>
    %c0_3 = arith.constant 0 : index
    %c0_4 = arith.constant 0 : index
    %5 = vector.load %arg6[%c0_3, %c0_4] : memref<1x512xf32, #tpu.memory_space<vmem>>, vector<1x512xf32>
    %cst = arith.constant dense<0.000000e+00> : vector<512xf32>
    %6 = vector.multi_reduction <add>, %4, %cst [0] : vector<2x512xf32> to vector<512xf32>
    %7 = vector.shape_cast %6 : vector<512xf32> to vector<1x512xf32>
    %8 = arith.addf %5, %7 : vector<1x512xf32>
    %c0_5 = arith.constant 0 : index
    %c0_6 = arith.constant 0 : index
    %9 = vector.load %arg6[%c0_5, %c0_6] : memref<1x512xf32, #tpu.memory_space<vmem>>, vector<1x512xf32>
    tpu.vector_store %arg6[%c0_5, %c0_6], %8 {strides = array<i32>} : memref<1x512xf32, #tpu.memory_space<vmem>>, vector<1x512xf32>,
    %c0_i32_7 = arith.constant 0 : i32
    %10 = arith.cmpi eq, %arg2, %c0_i32_7 : i32
    %11 = arith.extui %10 : i1 to i32
    %c0_i32_8 = arith.constant 0 : i32
    %12 = arith.cmpi ne, %11, %c0_i32_8 : i32
    scf.if %12 {
      %c0_9 = arith.constant 0 : index
      %c0_10 = arith.constant 0 : index
      %13 = vector.load %arg6[%c0_9, %c0_10] : memref<1x512xf32, #tpu.memory_space<vmem>>, vector<1x512xf32>
      %14 = vector.extract_strided_slice %13 {offsets = [0, 0], sizes = [1, 16], strides = [1, 1]} : vector<1x512xf32> to vector<1x16xf32>
      %15 = vector.extract_strided_slice %13 {offsets = [0, 16], sizes = [1, 16], strides = [1, 1]} : vector<1x512xf32> to vector<1x16xf32>
      %16 = arith.addf %14, %15 : vector<1x16xf32>
      %17 = vector.extract_strided_slice %13 {offsets = [0, 32], sizes = [1, 16], strides = [1, 1]} : vector<1x512xf32> to vector<1x16xf32>
      %18 = arith.addf %16, %17 : vector<1x16xf32>
      %19 = vector.extract_strided_slice %13 {offsets = [0, 48], sizes = [1, 16], strides = [1, 1]} : vector<1x512xf32> to vector<1x16xf32>
      %20 = arith.addf %18, %19 : vector<1x16xf32>
      %21 = vector.extract_strided_slice %13 {offsets = [0, 64], sizes = [1, 16], strides = [1, 1]} : vector<1x512xf32> to vector<1x16xf32>
      %22 = arith.addf %20, %21 : vector<1x16xf32>
      %23 = vector.extract_strided_slice %13 {offsets = [0, 80], sizes = [1, 16], strides = [1, 1]} : vector<1x512xf32> to vector<1x16xf32>
      %24 = arith.addf %22, %23 : vector<1x16xf32>
      %25 = vector.extract_strided_slice %13 {offsets = [0, 96], sizes = [1, 16], strides = [1, 1]} : vector<1x512xf32> to vector<1x16xf32>
      %26 = arith.addf %24, %25 : vector<1x16xf32>
      %27 = vector.extract_strided_slice %13 {offsets = [0, 112], sizes = [1, 16], strides = [1, 1]} : vector<1x512xf32> to vector<1x16xf32>
      %28 = arith.addf %26, %27 : vector<1x16xf32>
      %29 = vector.extract_strided_slice %13 {offsets = [0, 128], sizes = [1, 16], strides = [1, 1]} : vector<1x512xf32> to vector<1x16xf32>
      %30 = arith.addf %28, %29 : vector<1x16xf32>
      %31 = vector.extract_strided_slice %13 {offsets = [0, 144], sizes = [1, 16], strides = [1, 1]} : vector<1x512xf32> to vector<1x16xf32>
      %32 = arith.addf %30, %31 : vector<1x16xf32>
      %33 = vector.extract_strided_slice %13 {offsets = [0, 160], sizes = [1, 16], strides = [1, 1]} : vector<1x512xf32> to vector<1x16xf32>
      %34 = arith.addf %32, %33 : vector<1x16xf32>
      %35 = vector.extract_strided_slice %13 {offsets = [0, 176], sizes = [1, 16], strides = [1, 1]} : vector<1x512xf32> to vector<1x16xf32>
      %36 = arith.addf %34, %35 : vector<1x16xf32>
      %37 = vector.extract_strided_slice %13 {offsets = [0, 192], sizes = [1, 16], strides = [1, 1]} : vector<1x512xf32> to vector<1x16xf32>
      %38 = arith.addf %36, %37 : vector<1x16xf32>
      %39 = vector.extract_strided_slice %13 {offsets = [0, 208], sizes = [1, 16], strides = [1, 1]} : vector<1x512xf32> to vector<1x16xf32>
      %40 = arith.addf %38, %39 : vector<1x16xf32>
      %41 = vector.extract_strided_slice %13 {offsets = [0, 224], sizes = [1, 16], strides = [1, 1]} : vector<1x512xf32> to vector<1x16xf32>
      %42 = arith.addf %40, %41 : vector<1x16xf32>
      %43 = vector.extract_strided_slice %13 {offsets = [0, 240], sizes = [1, 16], strides = [1, 1]} : vector<1x512xf32> to vector<1x16xf32>
      %44 = arith.addf %42, %43 : vector<1x16xf32>
      %45 = vector.extract_strided_slice %13 {offsets = [0, 256], sizes = [1, 16], strides = [1, 1]} : vector<1x512xf32> to vector<1x16xf32>
      %46 = arith.addf %44, %45 : vector<1x16xf32>
      %47 = vector.extract_strided_slice %13 {offsets = [0, 272], sizes = [1, 16], strides = [1, 1]} : vector<1x512xf32> to vector<1x16xf32>
      %48 = arith.addf %46, %47 : vector<1x16xf32>
      %49 = vector.extract_strided_slice %13 {offsets = [0, 288], sizes = [1, 16], strides = [1, 1]} : vector<1x512xf32> to vector<1x16xf32>
      %50 = arith.addf %48, %49 : vector<1x16xf32>
      %51 = vector.extract_strided_slice %13 {offsets = [0, 304], sizes = [1, 16], strides = [1, 1]} : vector<1x512xf32> to vector<1x16xf32>
      %52 = arith.addf %50, %51 : vector<1x16xf32>
      %53 = vector.extract_strided_slice %13 {offsets = [0, 320], sizes = [1, 16], strides = [1, 1]} : vector<1x512xf32> to vector<1x16xf32>
      %54 = arith.addf %52, %53 : vector<1x16xf32>
      %55 = vector.extract_strided_slice %13 {offsets = [0, 336], sizes = [1, 16], strides = [1, 1]} : vector<1x512xf32> to vector<1x16xf32>
      %56 = arith.addf %54, %55 : vector<1x16xf32>
      %57 = vector.extract_strided_slice %13 {offsets = [0, 352], sizes = [1, 16], strides = [1, 1]} : vector<1x512xf32> to vector<1x16xf32>
      %58 = arith.addf %56, %57 : vector<1x16xf32>
      %59 = vector.extract_strided_slice %13 {offsets = [0, 368], sizes = [1, 16], strides = [1, 1]} : vector<1x512xf32> to vector<1x16xf32>
      %60 = arith.addf %58, %59 : vector<1x16xf32>
      %61 = vector.extract_strided_slice %13 {offsets = [0, 384], sizes = [1, 16], strides = [1, 1]} : vector<1x512xf32> to vector<1x16xf32>
      %62 = arith.addf %60, %61 : vector<1x16xf32>
      %63 = vector.extract_strided_slice %13 {offsets = [0, 400], sizes = [1, 16], strides = [1, 1]} : vector<1x512xf32> to vector<1x16xf32>
      %64 = arith.addf %62, %63 : vector<1x16xf32>
      %65 = vector.extract_strided_slice %13 {offsets = [0, 416], sizes = [1, 16], strides = [1, 1]} : vector<1x512xf32> to vector<1x16xf32>
      %66 = arith.addf %64, %65 : vector<1x16xf32>
      %67 = vector.extract_strided_slice %13 {offsets = [0, 432], sizes = [1, 16], strides = [1, 1]} : vector<1x512xf32> to vector<1x16xf32>
      %68 = arith.addf %66, %67 : vector<1x16xf32>
      %69 = vector.extract_strided_slice %13 {offsets = [0, 448], sizes = [1, 16], strides = [1, 1]} : vector<1x512xf32> to vector<1x16xf32>
      %70 = arith.addf %68, %69 : vector<1x16xf32>
      %71 = vector.extract_strided_slice %13 {offsets = [0, 464], sizes = [1, 16], strides = [1, 1]} : vector<1x512xf32> to vector<1x16xf32>
      %72 = arith.addf %70, %71 : vector<1x16xf32>
      %73 = vector.extract_strided_slice %13 {offsets = [0, 480], sizes = [1, 16], strides = [1, 1]} : vector<1x512xf32> to vector<1x16xf32>
      %74 = arith.addf %72, %73 : vector<1x16xf32>
      %75 = vector.extract_strided_slice %13 {offsets = [0, 496], sizes = [1, 16], strides = [1, 1]} : vector<1x512xf32> to vector<1x16xf32>
      %76 = arith.addf %74, %75 : vector<1x16xf32>
      %c0_11 = arith.constant 0 : index
      %77 = memref.load %arg3[%c0_11] : memref<3xf32, #tpu.memory_space<smem>>
      %c1 = arith.constant 1 : index
      %78 = memref.load %arg3[%c1] : memref<3xf32, #tpu.memory_space<smem>>
      %c2 = arith.constant 2 : index
      %79 = memref.load %arg3[%c2] : memref<3xf32, #tpu.memory_space<smem>>
      %cst_12 = arith.constant 1.562500e-01 : f32
      %80 = vector.broadcast %cst_12 : f32 to vector<1x16xf32>
      %81 = arith.mulf %76, %80 : vector<1x16xf32>
      %82 = vector.broadcast %77 : f32 to vector<1x16xf32>
      %83 = arith.subf %81, %82 : vector<1x16xf32>
      %84 = arith.negf %83 : vector<1x16xf32>
      %85 = math.exp %84 : vector<1x16xf32>
      %cst_13 = arith.constant 1.000000e+00 : f32
      %86 = vector.broadcast %cst_13 : f32 to vector<1x16xf32>
      %87 = arith.addf %86, %85 : vector<1x16xf32>
      %88 = arith.divf %86, %87 : vector<1x16xf32>
      %89 = vector.broadcast %78 : f32 to vector<1x16xf32>
      %90 = arith.subf %88, %89 : vector<1x16xf32>
      %91 = vector.broadcast %79 : f32 to vector<1x16xf32>
      %92 = arith.mulf %90, %91 : vector<1x16xf32>
      %c0_14 = arith.constant 0 : index
      %c0_15 = arith.constant 0 : index
      %c0_16 = arith.constant 0 : index
      %93 = vector.load %arg5[%c0_14, %c0_15, %c0_16] : memref<1x1x16xf32, #tpu.memory_space<vmem>>, vector<1x1x16xf32>
      %94 = vector.shape_cast %93 : vector<1x1x16xf32> to vector<1x16xf32>
      %95 = vector.shape_cast %92 : vector<1x16xf32> to vector<1x1x16xf32>
      tpu.vector_store %arg5[%c0_14, %c0_15, %c0_16], %95 {strides = array<i32>} : memref<1x1x16xf32, #tpu.memory_space<vmem>>, vector<1x1x16xf32>,
    } else {
    }
    return
  }
  func.func @transform_0(%arg0: i32, %arg1: i32, %arg2: i32) -> i32 {
    %c0_i32 = arith.constant 0 : i32
    %c0_i32_0 = arith.constant 0 : i32
    return %c0_i32 : i32
  }
  func.func @transform_1(%arg0: i32, %arg1: i32, %arg2: i32) -> (i32, i32, i32) {
    %c0_i32 = arith.constant 0 : i32
    return %arg0, %arg2, %arg1 : i32, i32, i32
  }
  func.func @transform_2(%arg0: i32, %arg1: i32, %arg2: i32) -> (i32, i32, i32) {
    %c0_i32 = arith.constant 0 : i32
    %c0_i32_0 = arith.constant 0 : i32
    return %arg0, %c0_i32, %arg1 : i32, i32, i32
  }
}

</mosaic_0001>

<bundles_post_ra>
// kernel: tpu_custom_call.1
= control target key start
LH: loop header
LB: loop body
LE: loop exit
PB: predicated region body
PF: predicated region fallthrough
CT: control target
= control target key end

     0   :  { %7 = vsyncpa [#allocation6], 0  ;;  %s1043_s0 = inlined_call_operand.hbm [shape: f32[3], index: 0, kind: input, shape index: {}]   ;;  %s1044_s1 = inlined_call_operand.hbm [shape: f32[2,2,512], index: 1, kind: input, shape index: {}]   ;;  %s1045_s2 = inlined_call_operand.hbm [shape: f32[2,1,16], index: 2, kind: output, shape index: {}]  }
   0x1   :  { %8 = vsyncpa [#allocation4], 0 }
   0x2   :  { %10 = vsyncpa [#allocation4 + $0x1], 0 }
   0x3   :  { %11 = vsyncpa [#allocation5], 0 }
   0x4   :  { %13 = vsyncpa [#allocation5 + $0x1], 0  ;;  %s795_s9 = smov 0   ;;  %s797_s10 = smov 0  }
   0x5   :  { %s799_s11 = smov 0   ;;  %s801_s12 = smov 0  }
   0x6   :  { %s803_s13 = smov 0   ;;  %s805_s14 = smov 0  }
   0x7 LB: > { %s530_s15 = sadd.s32 4294967295, %s765_s14   ;;  %s531_s16 = sadd.s32 4294967294, %s765_s14   ;;  %s765_s14 = sphi %s805_s14, %s19_s14   ;;  %s761_s13 = sphi %s803_s13, %s1071_s13   ;;  %s757_s12 = sphi %s801_s12, %s1070_s12   ;;  %s753_s11 = sphi %s799_s11, %s1069_s11   ;;  %s749_s10 = sphi %s797_s10, %s1068_s10   ;;  %s745_s9 = sphi %s795_s9, %s1067_s9  }
   0x8   : > { %p83_p0 = scmp.ne.s32.totalorder %s749_s10, %s745_s9  ;;  %p829_p1 = scmp.eq.s32.totalorder %s530_s15, 0 }
   0x9   : > { %p833_p2 = scmp.eq.s32.totalorder %s530_s15, 1  ;;  %p115_p3 = scmp.eq.s32.totalorder %s531_s16, 1 }
   0xa   : > { %s1050_s17 = scalar_select %p829_p1, 1, 0 }
   0xb   : > { %p839_p4 = por %p829_p1, %p83_p0  ;;  %p532_p5 = scmp.ge.s32.totalorder %s765_s14, 1 }
   0xc   : > { %p844_p6 = por %p115_p3, %p83_p0  ;;  %p122_p7 = scmp.lt.s32.totalorder %s765_s14, 3 }
   0xd   : > { %s1052_s19 = scalar_select %p839_p4, 1, 0 }
   0xe   : > { %s1053_s20 = scalar_select %p844_p6, 1, 0 }
   0xf   : > { %p849_p8 = pnand %p532_p5, %p122_p7  ;;  %s38_s22 = sadd.s32 1, %s761_s13 }
  0x10   : > { %p863_p12 = scmp.ge.s32.totalorder %s38_s22, 2  ;;  %s70_s25 = sadd.s32 1, %s753_s11 }
  0x11   : > { %p556_p10 = pneg %p849_p8  ;;  %p77_p13 = scmp.ne.s32.totalorder %s753_s11, %s749_s10 }
  0x12   : > { %p78_p0 = scmp.eq.s32.totalorder %s765_s14, 0  ;;  %s636_s28 = scalar_lea.hbm %s1043_s0, 16 }
  0x13   : > { %p859_p11 = pnand %p556_p10, %p829_p1  ;;  %p637_p3 = scmp.ne.s32.totalorder %s1043_s0, %s636_s28 }
  0x14   : > { %p643_p9 = scmp.lt.u32.totalorder %s636_s28, %s1043_s0 }
  0x15   : > { %p638_p5 = pneg %p859_p11 }
  0x17   : > { %p639_p7 = pnand %p638_p5, %p637_p3 }
  0x19   : > { %p640_p10 = pneg %p639_p7 }
  0x1b   : > { %p645_p6 = pnand %p643_p9, %p640_p10 }
  0x1d   : > { %648 = shalt.err (!%p645_p6)
}
  0x1e   : > { %s767_s5 = smov [#allocation3]   ;;  %s1073_s22 = smov (%p863_p12, %s38_s22), 0 }
  0x1f   : > { %559 = dma.hbm_to_smem (!%p859_p11), %s1043_s0, 16, %s767_s5, [#allocation6]  }
  0x20   : > { %p894_p6 = por %p78_p0, %p77_p13  ;;  %p903_p9 = por %p833_p2, %p77_p13 }
  0x21   : > { %s63_s16 = ssub.s32 %s761_s13, %s1073_s22  ;;  %p569_p3 = scmp.lt.s32.totalorder %s765_s14, 2 }
  0x22   : > { %s1058_s15 = scalar_select %p903_p9, 1, 0 }
  0x23   : > { %p68_p5 = scmp.eq.s32.totalorder %s63_s16, 0  ;;  %s144_s23 = sand.u32 1, %s753_s11  }
  0x24   : > { %s535_s24 = sshll.u32 %s144_s23, 3  ;;  %s547_s27 = sshll.u32 %s761_s13, 7 }
  0x25   : > { %s912_s26 = scalar_select %p68_p5, %s753_s11, %s70_s25  }
  0x26   : > { %s918_s30 = scalar_lea.hbm %s1044_s1, %s547_s27  ;;  %s148_s18 = scalar_lea.vmem [#allocation7], %s535_s24 }
  0x27   : > { %s160_s3 = sshll.u32 %s148_s18, 4  ;;  %p924_p2 = pnand %p569_p3, %p894_p6  ;;  %s920_s3 = int_to_ptr.vmem [resolvable:$true] %s160_s3 }
  0x28   : > { %s145_s25 = scalar_lea.sflag [#allocation4], %s144_s23  ;;  %s649_s5 = scalar_lea.hbm %s918_s30, 128 }
  0x29   : > { %p650_p11 = scmp.ne.s32.totalorder %s918_s30, %s649_s5  ;;  %p651_p12 = pneg %p924_p2 }
  0x2a   : > { %s654_s16 = scalar_lea.hbm %s1044_s1, 256  ;;  %p655_p7 = scmp.lt.u32.totalorder %s918_s30, %s1044_s1 }
  0x2b   : > { %p652_p13 = pnand %p651_p12, %p650_p11  ;;  %p656_p10 = scmp.lt.u32.totalorder %s654_s16, %s649_s5 }
  0x2c   : > { %p658_p3 = scmp.lt.u32.totalorder %s649_s5, %s918_s30 }
  0x2d   : > { %p653_p0 = pneg %p652_p13  ;;  %p657_p6 = por %p656_p10, %p655_p7 }
  0x2f   : > { %p659_p5 = por %p658_p3, %p657_p6 }
  0x31   : > { %p660_p9 = pnand %p659_p5, %p653_p0 }
  0x33   : > { %663 = shalt.err (!%p660_p9)
}
  0x34   : > { %s664_s23 = scalar_lea.vmem %s920_s3, 128  ;;  %s768_s27 = smov [#allocation7]  }
  0x35   : > { %p665_p11 = scmp.ne.s32.totalorder %s920_s3, %s664_s23  ;;  %s669_s28 = sshll.u32 %s768_s27, 4  ;;  %s670_s28 = int_to_ptr.vmem [resolvable:$false] %s669_s28 }
  0x36   : > { %s671_s29 = scalar_lea.vmem %s670_s28, 256  ;;  %p672_p1 = scmp.lt.s32.totalorder %s920_s3, %s670_s28 }
  0x37   : > { %p667_p13 = pnand %p665_p11, %p651_p12  ;;  %p673_p7 = scmp.lt.s32.totalorder %s671_s29, %s664_s23 }
  0x39   : > { %p668_p4 = pneg %p667_p13  ;;  %p674_p10 = por %p673_p7, %p672_p1 }
  0x3b   : > { %p675_p6 = pnand %p674_p10, %p668_p4 }
  0x3d   : > { %678 = shalt.err (!%p675_p6)
}
  0x3e   : > { %563 = dma.hbm_to_vmem [thread:$0]  (!%p924_p2), %s918_s30, 128, %s920_s3, %s145_s25  }
  0x3f   : > { %169 = sbr.rel (%p849_p8) target bundleno = 346 (0x15a), region = 28  ;;  %p1060_p9 = scmp.ne.s32.totalorder (!%p849_p8), %s1050_s17, 0 }
  0x46   : > { %732 = dma.done.wait (%p1060_p9), [#allocation6], 16  }
  0x47   : > { %734 = vsyncadd (%p1060_p9), [#allocation6], 4294967280  ;;  %s960_s18 = sand.u32 1, %s749_s10   ;;  %p1061_p1 = scmp.ne.s32.totalorder %s1052_s19, 0 }
  0x48   : > { %s540_s5 = sshll.u32 %s960_s18, 3  ;;  %s176_s4 = scalar_lea.sflag [#allocation4], %s960_s18 }
  0x49   : > { %s179_s6 = scalar_lea.vmem [#allocation7], %s540_s5 }
  0x4a   : > { %736 = dma.done.wait (%p1061_p1), %s176_s4, 128  }
  0x4b   : > { %738 = vsyncadd (%p1061_p1), %s176_s4, 4294967168 }
  0x4c   : > { %184 = sfence }
  0x4d   : > { %v205_v0 = vlaneseq  ;;  %v210_v1 = vld [vmem:[%s179_s6] sm:$0xff]  ;;  %v769_v2 = vmov 1983009808   ;;  %v770_v6 = vmov 0.0   ;;  %vm234_vm1 = vcmask 1041408   ;;  %s772_s17 = smov 112  }
  0x4e   : > { %v215_v3 = vunpack.c.l.s4 %v769_v2  ;;  %v213_v7 = vcombine.high %v210_v1, %v210_v1  ;;  %v771_v24 = vmov 1966171168   ;;  %s773_s19 = smov 80   ;;  %s774_s21 = smov 96   ;;  %vm419_vm2 = vcmask 122880  }
  0x4f   : > { %vm968_vm0 = vcmp.lt.s32.totalorder %v205_v0, 512  ;;  %v218_v5 = vshrl.u32 %v205_v0, 7  ;;  %v270_v25 = vunpack.c.l.s4 %v771_v24  ;;  %s775_s30 = smov 64   ;;  %s776_s3 = smov 48  }
  0x50   : > { %209 = vst.msk [vmem:[#allocation2] sm:$0xf] %vm968_vm0, %v770_v6  ;;  %v216_v8 = vunpack.c.0.s8 %v215_v3  ;;  %s777_s25 = smov 32   ;;  %s778_s7 = smov 16  }
  0x51   : > { %v271_v34 = vunpack.c.0.s8 %v270_v25  ;;  %s403_s16 = sld [smem:[#allocation3]]  ;;  %s541_s8 = sld [smem:[#allocation3 + $0x1]] }
  0x52   : > { %v219_v9 = vsub.s32 %v216_v8, %v218_v5  ;;  %s542_s24 = sld [smem:[#allocation3 + $0x2]]  ;;  %s544_s23 = sshll.u32 %s757_s12, 4 }
  0x53   : > { %v274_v45 = vsub.s32 %v271_v34, %v218_v5  ;;  %s199_s27 = scalar_lea.vmem [#allocation8], %s960_s18  ;;  %s994_s4 = scalar_lea.hbm %s1045_s2, %s544_s23 }
  0x54   : > { %v220_v10 = vrot.slane %v210_v1, %v219_v9  ;;  %v227_v11 = vrot.slane %v213_v7, %v219_v9  ;;  %s435_s28 = sshll.u32 %s199_s27, 4  ;;  %s422_s6 = scalar_lea.sflag [#allocation5], %s960_s18  ;;  %s996_s28 = int_to_ptr.vmem [resolvable:$true] %s435_s28 }
  0x55   : > { %p1064_p8 = scmp.ne.s32.totalorder %s1058_s15, 0  ;;  %s779_s12 = smov [#allocation8]  }
  0x56   : > { %v228_v12 = vcombine.high %v220_v10, %v220_v10  ;;  %v229_v13 = vcombine.high %v227_v11, %v227_v11  ;;  %v235_v14 = vsel %vm234_vm1, %v220_v10, 0.0  ;;  %v249_v15 = vsel %vm234_vm1, %v227_v11, 0.0 }
  0x57   : > { %v236_v16 = vrot.slane %v235_v14, 4  ;;  %v250_v17 = vrot.slane %v249_v15, 4  ;;  %v211_v51 = vld [vmem:[#allocation2] sm:$0xf] }
  0x58   : > { %v242_v18 = vsel %vm234_vm1, %v228_v12, 0.0  ;;  %v256_v19 = vsel %vm234_vm1, %v229_v13, 0.0 }
  0x59   : > { %v237_v20 = vadd.f32 %v236_v16, %v235_v14  ;;  %v243_v21 = vrot.slane %v242_v18, 4  ;;  %v251_v22 = vadd.f32 %v250_v17, %v249_v15  ;;  %v257_v23 = vrot.slane %v256_v19, 4 }
  0x5b   : > { %v238_v26 = vrot.slane %v237_v20, 2  ;;  %v244_v27 = vadd.f32 %v243_v21, %v242_v18  ;;  %v252_v28 = vrot.slane %v251_v22, 2  ;;  %v258_v29 = vadd.f32 %v257_v23, %v256_v19 }
  0x5d   : > { %v239_v30 = vadd.f32 %v238_v26, %v237_v20  ;;  %v245_v31 = vrot.slane %v244_v27, 2  ;;  %v253_v32 = vadd.f32 %v252_v28, %v251_v22  ;;  %v259_v33 = vrot.slane %v258_v29, 2 }
  0x5f   : > { %v240_v35 = vrot.slane %v239_v30, 1  ;;  %v246_v36 = vadd.f32 %v245_v31, %v244_v27  ;;  %v254_v37 = vrot.slane %v253_v32, 1  ;;  %v260_v38 = vadd.f32 %v259_v33, %v258_v29 }
  0x61   : > { %v241_v39 = vadd.f32 %v240_v35, %v239_v30  ;;  %v247_v40 = vrot.slane %v246_v36, 1  ;;  %v255_v41 = vadd.f32 %v254_v37, %v253_v32  ;;  %v261_v42 = vrot.slane %v260_v38, 1 }
  0x63   : > { %v248_v43 = vadd.f32 %v247_v40, %v246_v36  ;;  %v262_v44 = vadd.f32 %v261_v42, %v260_v38 }
  0x65   : > { %v267_v46 = vcombine.low %v241_v39, %v248_v43  ;;  %v268_v47 = vcombine.low %v255_v41, %v262_v44 }
  0x67   : > { %v275_v48 = vrot.slane %v267_v46, %v274_v45  ;;  %v282_v49 = vrot.slane %v268_v47, %v274_v45 }
  0x69   : > { %v283_v50 = vcombine.low %v275_v48, %v282_v49 }
  0x6b   : > { %v290_v52 = vrot.slane %v283_v50, %v274_v45 }
  0x6d   : > { %v292_v53 = vadd.f32 %v290_v52, %v211_v51 }
  0x6f   : > { %297 = vst.msk [vmem:[#allocation2] sm:$0xf] %vm968_vm0, %v292_v53  ;;  %v407_v53 = vstv %s403_s16 }
  0x76   : > { %v976_v54 = vld [vmem:[#allocation2] sm:$0xf] }
  0x77   : > { %303 = vrot.lane.b32.xlu0 %v976_v54, %s772_s17  ;;  %311 = vrot.lane.b32.xlu1 %v976_v54, %s773_s19  ;;  %v331_v4 = vrot.slane %v976_v54, 1  ;;  %v355_v20 = vrot.slane %v976_v54, 2  ;;  %v379_v36 = vrot.slane %v976_v54, 3  ;;  %s679_s17 = scalar_lea.vmem %s996_s28, 16  ;;  %s683_s19 = sshll.u32 %s779_s12, 4  ;;  %s684_s19 = int_to_ptr.vmem [resolvable:$false] %s683_s19 }
  0x78   : > { %p680_p4 = scmp.ne.s32.totalorder %s996_s28, %s679_s17  ;;  %p686_p0 = scmp.lt.s32.totalorder %s996_s28, %s684_s19 }
  0x7a   : > { %p681_p2 = pnand %p680_p4, %p1064_p8 }
  0x7b   : > { %307 = vrot.lane.b32.xlu0 %v976_v54, %s774_s21  ;;  %315 = vrot.lane.b32.xlu1 %v976_v54, %s775_s30  ;;  %s685_s21 = scalar_lea.vmem %s684_s19, 32 }
  0x7c   : > { %p682_p12 = pneg %p681_p2  ;;  %p687_p3 = scmp.lt.s32.totalorder %s685_s21, %s679_s17 }
  0x7e   : > { %p688_p5 = por %p687_p3, %p686_p0 }
  0x7f   : > { %319 = vrot.lane.b32.xlu0 %v976_v54, %s776_s3  ;;  %323 = vrot.lane.b32.xlu1 %v976_v54, %s777_s25 }
  0x80   : > { %p689_p11 = pnand %p688_p5, %p682_p12 }
  0x83   : > { %327 = vrot.lane.b32.xlu0 %v976_v54, %s778_s7 }
  0xe9   : > { %v304_v55 = vpop.permute.xlu0 %303  ;;  %v312_v56 = vpop.permute.xlu1 %311 }
  0xea   : > { %v306_v57 = vadd.f32 %v304_v55, %v976_v54  ;;  %v334_v6 = vrot.slane %v304_v55, 1  ;;  %v340_v10 = vrot.slane %v312_v56, 1  ;;  %v358_v22 = vrot.slane %v304_v55, 2 }
  0xeb   : > { %v364_v26 = vrot.slane %v312_v56, 2  ;;  %v382_v38 = vrot.slane %v304_v55, 3  ;;  %v388_v42 = vrot.slane %v312_v56, 3 }
  0xed   : > { %v308_v58 = vpop.permute.xlu0 %307  ;;  %v316_v59 = vpop.permute.xlu1 %315 }
  0xee   : > { %v310_v60 = vadd.f32 %v308_v58, %v306_v57  ;;  %v337_v8 = vrot.slane %v308_v58, 1  ;;  %v343_v12 = vrot.slane %v316_v59, 1  ;;  %v361_v24 = vrot.slane %v308_v58, 2 }
  0xef   : > { %v367_v28 = vrot.slane %v316_v59, 2  ;;  %v385_v40 = vrot.slane %v308_v58, 3  ;;  %v391_v44 = vrot.slane %v316_v59, 3 }
  0xf0   : > { %v314_v61 = vadd.f32 %v312_v56, %v310_v60 }
  0xf1   : > { %v320_v62 = vpop.permute.xlu0 %319  ;;  %v324_v0 = vpop.permute.xlu1 %323 }
  0xf2   : > { %v318_v63 = vadd.f32 %v316_v59, %v314_v61  ;;  %v346_v14 = vrot.slane %v320_v62, 1  ;;  %v349_v16 = vrot.slane %v324_v0, 1  ;;  %v370_v30 = vrot.slane %v320_v62, 2 }
  0xf3   : > { %v373_v32 = vrot.slane %v324_v0, 2  ;;  %v394_v46 = vrot.slane %v320_v62, 3  ;;  %v397_v48 = vrot.slane %v324_v0, 3  ;;  %v415_v59 = vstv %s541_s8 }
  0xf4   : > { %v322_v1 = vadd.f32 %v320_v62, %v318_v63  ;;  %v417_v61 = vstv %s542_s24 }
  0xf5   : > { %v328_v2 = vpop.permute.xlu0 %327 }
  0xf6   : > { %v326_v3 = vadd.f32 %v324_v0, %v322_v1  ;;  %v352_v19 = vrot.slane %v328_v2, 1  ;;  %v376_v35 = vrot.slane %v328_v2, 2  ;;  %v400_v51 = vrot.slane %v328_v2, 3 }
  0xf8   : > { %v330_v5 = vadd.f32 %v328_v2, %v326_v3 }
  0xfa   : > { %v333_v7 = vadd.f32 %v331_v4, %v330_v5 }
  0xfc   : > { %v336_v9 = vadd.f32 %v334_v6, %v333_v7 }
  0xfe   : > { %v339_v11 = vadd.f32 %v337_v8, %v336_v9 }
 0x100   : > { %v342_v13 = vadd.f32 %v340_v10, %v339_v11 }
 0x102   : > { %v345_v15 = vadd.f32 %v343_v12, %v342_v13 }
 0x104   : > { %v348_v17 = vadd.f32 %v346_v14, %v345_v15 }
 0x106   : > { %v351_v18 = vadd.f32 %v349_v16, %v348_v17 }
 0x108   : > { %v354_v21 = vadd.f32 %v352_v19, %v351_v18 }
 0x10a   : > { %v357_v23 = vadd.f32 %v355_v20, %v354_v21 }
 0x10c   : > { %v360_v25 = vadd.f32 %v358_v22, %v357_v23 }
 0x10e   : > { %v363_v27 = vadd.f32 %v361_v24, %v360_v25 }
 0x110   : > { %v366_v29 = vadd.f32 %v364_v26, %v363_v27 }
 0x112   : > { %v369_v31 = vadd.f32 %v367_v28, %v366_v29 }
 0x114   : > { %v372_v33 = vadd.f32 %v370_v30, %v369_v31 }
 0x116   : > { %v375_v34 = vadd.f32 %v373_v32, %v372_v33 }
 0x118   : > { %v378_v37 = vadd.f32 %v376_v35, %v375_v34 }
 0x11a   : > { %v381_v39 = vadd.f32 %v379_v36, %v378_v37 }
 0x11c   : > { %v384_v41 = vadd.f32 %v382_v38, %v381_v39 }
 0x11e   : > { %v387_v43 = vadd.f32 %v385_v40, %v384_v41 }
 0x120   : > { %v390_v45 = vadd.f32 %v388_v42, %v387_v43 }
 0x122   : > { %v393_v47 = vadd.f32 %v391_v44, %v390_v45 }
 0x124   : > { %v396_v49 = vadd.f32 %v394_v46, %v393_v47 }
 0x126   : > { %v399_v50 = vadd.f32 %v397_v48, %v396_v49 }
 0x128   : > { %v402_v52 = vadd.f32 %v400_v51, %v399_v50 }
 0x12a   : > { %v406_v54 = vmul.f32 0.15625, %v402_v52 }
 0x12c   : > { %v408_v55 = vsub.f32 %v406_v54, %v407_v53 }
 0x12e   : > { %v543_v57 = vmul.f32 -1.442695, %v408_v55 }
 0x130   : > { %632 = vpow2.f32 %v543_v57 }
 0x13a   : > { %v633_v58 = vpop.eup %632 }
 0x13b   : > { %v412_v56 = vadd.f32 1.0, %v633_v58 }
 0x13d   : > { %634 = vrcp.f32 %v412_v56 }
 0x147   : > { %v635_v60 = vpop.eup %634 }
 0x148   : > { %v416_v62 = vsub.f32 %v635_v60, %v415_v59 }
 0x14a   : > { %v418_v63 = vmul.f32 %v417_v61, %v416_v62 }
 0x14c   : > { %420 = vst.msk [vmem:[%s199_s27] sm:$0x1] %vm419_vm2, %v418_v63 }
 0x14d   : > { %692 = shalt.err (!%p689_p11)
}
 0x14e   : > { %s693_s18 = scalar_lea.hbm %s994_s4, 16  ;;  %s697_s25 = scalar_lea.hbm %s1045_s2, 32 }
 0x14f   : > { %p694_p13 = scmp.ne.s32.totalorder %s994_s4, %s693_s18  ;;  %p698_p6 = scmp.lt.u32.totalorder %s994_s4, %s1045_s2 }
 0x150   : > { %p699_p9 = scmp.lt.u32.totalorder %s697_s25, %s693_s18  ;;  %p701_p4 = scmp.lt.u32.totalorder %s693_s18, %s994_s4 }
 0x151   : > { %p695_p7 = pnand %p694_p13, %p1064_p8 }
 0x152   : > { %p700_p1 = por %p699_p9, %p698_p6 }
 0x153   : > { %p696_p10 = pneg %p695_p7 }
 0x154   : > { %p702_p2 = por %p701_p4, %p700_p1 }
 0x156   : > { %p703_p12 = pnand %p702_p2, %p696_p10 }
 0x158   : > { %706 = shalt.err (!%p703_p12)
}
 0x159   : > { %554 = dma.vmem_to_hbm [thread:$0]  (%p1064_p8), %s996_s28, 16, %s994_s4, %s422_s6  }
 0x15a PF: > { %s447_s8 = sand.u32 1, %s745_s9   ;;  %p1065_p0 = scmp.ne.s32.totalorder %s1053_s20, 0 }
 0x15b   : > { %p1066_p3 = scmp.ge.s32.totalorder %s765_s14, 2  ;;  %s448_s24 = scalar_lea.sflag [#allocation5], %s447_s8 }
 0x15d   : > { %p565_p5 = pnand %p1066_p3, %p1065_p0 }
 0x15f   : > { %740 = dma.done.wait (!%p565_p5), %s448_s24, 16  }
 0x160   : > { %742 = vsyncadd (!%p565_p5), %s448_s24, 4294967280  ;;  %s19_s14 = sadd.s32 1, %s765_s14   ;;  %s1067_s9 = smov %s749_s10 }
 0x161   : > { %p16_p11 = scmp.ge.s32.totalorder %s19_s14, 4   ;;  %s1068_s10 = smov %s753_s11 }
 0x162   : > { %s1069_s11 = smov %s912_s26  ;;  %s1070_s12 = smov %s761_s13 }
 0x163   : > { %s1071_s13 = smov %s1073_s22  ;;  %18 = sbr.rel (!%p16_p11) target bundleno = 7 (0x7), region = 86 }
 0x16a   :  { %452 = vsyncpa [#allocation4], 1 }
 0x16b   :  { %454 = vsyncpa [#allocation4 + $0x1], 1 }
 0x16c   :  { %455 = vsyncpa [#allocation5], 1 }
 0x16d   :  { %457 = vsyncpa [#allocation5 + $0x1], 1 }
 0x16e   :  { %458 = vsyncpa [#allocation6], 1 }
 0x16f   :  { %460 = vsyncpa [#allocation6 + $0x1], 1 }

</bundles_post_ra>
